<compile_context>
chip_gen: v7x
topology: tpu7x:2x2x1
jax: 0.10.0
libtpu: 0.0.40
codegen_flags: <defaults>
</compile_context>

<pallas_src>
import functools

import jax
import jax.numpy as jnp
from jax import lax
from jax.experimental import pallas as pl
from jax.experimental.pallas import tpu as pltpu


def _round_up(x, n):
    return (x + n - 1) // n * n


def _vmem_limits():
    """Returns (vmem_limit_bytes for CompilerParams, working-set budget)."""
    try:
        cap = int(pltpu.get_tpu_info().vmem_capacity_bytes)
    except Exception:
        cap = 64 << 20  # conservative fallback: assume v7x-sized (64 MiB) VMEM
    limit = (cap * 3) // 4          # 96 MiB on 128 MiB parts, 48 MiB on v7x
    budget = limit - (4 << 20)      # headroom for compiler-internal scratch
    return int(limit), int(budget)


def _pad_m(m, stream_dtype):
    """Dtype-aware M padding: full sublane packing, lane-dense acc for big M."""
    if m >= 128:
        return _round_up(m, 128)
    sublane = max(8, 32 // jnp.dtype(stream_dtype).itemsize)  # f32:8 bf16:16
    return _round_up(m, sublane)


def _pick_tk(k, m_pad, stream_bytes, budget_bytes, tk=None):
    """K-tile size: VMEM-budget derived, preferring a divisor of the
    128-aligned K so the wrapper never pads K beyond lane alignment."""
    k128 = _round_up(k, 128)
    if tk is not None:
        return min(_round_up(int(tk), 128), k128)
    # fixed VMEM: f32 accumulator + f32 target (double counted for slack) + 1 MiB
    fixed = 4 * m_pad * m_pad * 4 + (1 << 20)
    avail = max(budget_bytes - fixed, 2 * m_pad * 128 * stream_bytes)
    tk_budget = max((avail // (2 * m_pad * stream_bytes)) // 128 * 128, 128)
    if tk_budget >= k128:
        return k128                                   # single K step, no pad
    n = k128 // 128
    d = min(tk_budget // 128, n)
    while n % d != 0:                                  # largest divisor <= budget
        d -= 1
    tk_div = d * 128
    steps_div = n // d
    steps_budget = -(-k128 // tk_budget)
    if steps_div > 2 * steps_budget:
        # divisor constraint too costly -> accept a (small) pad to tk multiple
        return tk_budget
    return tk_div


def _prep_features(x, m, k, m_pad, tk, stream_dtype):
    """NCHW -> (m_pad, k_grid) feature view in stream_dtype. Zero padding is
    exact for F @ F^T (padded rows/cols of G are zero)."""
    feats = x.reshape(m, k).astype(stream_dtype)
    k_grid = _round_up(_round_up(k, 128), tk)
    if (m_pad, k_grid) != (m, k):
        feats = jnp.pad(feats, ((0, m_pad - m), (0, k_grid - k)))
    return feats, k_grid


def _gram_step(feat_ref, acc_ref):
    # Contract both operands on K: no transposed copy (no XLU transpose); one
    # VMEM tile feeds the MXU as both LHS and RHS; f32 accumulation.
    f = feat_ref[...]
    acc_ref[...] += lax.dot_general(
        f, f,
        dimension_numbers=(((1,), (1,)), ((), ())),
        preferred_element_type=jnp.float32,
    )


def _gram_kernel(feat_ref, g_ref, *, inv_norm):
    kk = pl.program_id(0)

    @pl.when(kk == 0)
    def _():
        g_ref[...] = jnp.zeros_like(g_ref)

    _gram_step(feat_ref, g_ref)

    @pl.when(kk == pl.num_programs(0) - 1)
    def _():
        g_ref[...] *= inv_norm


def _style_loss_kernel(feat_ref, target_hbm, loss_ref, acc_ref, tgt_ref,
                       tgt_sem, *, inv_norm, inv_mse_denom):
    kk = pl.program_id(0)

    @pl.when(kk == 0)
    def _():
        acc_ref[...] = jnp.zeros_like(acc_ref)
        # Target gram: one single-buffered DMA, overlapped with the whole
        # K-streaming loop (cheaper than a double-buffered BlockSpec input).
        pltpu.make_async_copy(target_hbm, tgt_ref, tgt_sem.at[0]).start()

    _gram_step(feat_ref, acc_ref)

    # MSE epilogue only once, on the last K step.
    @pl.when(kk == pl.num_programs(0) - 1)
    def _():
        pltpu.make_async_copy(target_hbm, tgt_ref, tgt_sem.at[0]).wait()
        g = acc_ref[...] * inv_norm
        diff = g - tgt_ref[...]
        loss_ref[0, 0] = jnp.sum(diff * diff) * inv_mse_denom


def gram_matrix(x, *, tk=None, stream_dtype=jnp.bfloat16):
    """Pallas gram matrix of an NCHW tensor, matching StyleLoss.gram_matrix."""
    a, b, c, d = x.shape
    m, k = a * b, c * d
    stream_dtype = jnp.dtype(stream_dtype)
    vmem_limit, budget = _vmem_limits()
    m_pad = _pad_m(m, stream_dtype)
    tk = _pick_tk(k, m_pad, stream_dtype.itemsize, budget, tk)
    feats, k_grid = _prep_features(x, m, k, m_pad, tk, stream_dtype)
    inv_norm = 1.0 / float(a * b * c * d)

    cost = pl.CostEstimate(
        flops=int(2 * m_pad * m_pad * k_grid),
        transcendentals=0,
        bytes_accessed=int(m_pad * k_grid * stream_dtype.itemsize
                           + m_pad * m_pad * 4),
    )
    g = pl.pallas_call(
        functools.partial(_gram_kernel, inv_norm=inv_norm),
        out_shape=jax.ShapeDtypeStruct((m_pad, m_pad), jnp.float32),
        grid=(k_grid // tk,),
        in_specs=[pl.BlockSpec((m_pad, tk), lambda kk: (0, kk))],
        out_specs=pl.BlockSpec((m_pad, m_pad), lambda kk: (0, 0)),  # resident acc
        compiler_params=pltpu.CompilerParams(
            dimension_semantics=("arbitrary",),
            vmem_limit_bytes=vmem_limit),
        cost_estimate=cost,
    )(feats)
    return g[:m, :m] if m_pad != m else g


def style_loss_forward(x, target_gram, *, tk=None, stream_dtype=jnp.bfloat16):
    """StyleLoss.forward: returns (input unchanged, loss). Gram + MSE fused;
    the gram never leaves VMEM."""
    a, b, c, d = x.shape
    m, k = a * b, c * d
    stream_dtype = jnp.dtype(stream_dtype)
    vmem_limit, budget = _vmem_limits()
    m_pad = _pad_m(m, stream_dtype)
    tk = _pick_tk(k, m_pad, stream_dtype.itemsize, budget, tk)
    feats, k_grid = _prep_features(x, m, k, m_pad, tk, stream_dtype)

    tgt = target_gram.astype(jnp.float32)
    if m_pad != m:
        # Padded gram rows/cols are zero, so zero-padding the target keeps the
        # squared-diff sum identical; the mean divisor stays m*m.
        tgt = jnp.pad(tgt, ((0, m_pad - m), (0, m_pad - m)))

    inv_norm = 1.0 / float(a * b * c * d)
    inv_mse_denom = 1.0 / float(m * m)

    cost = pl.CostEstimate(
        flops=int(2 * m_pad * m_pad * k_grid + 3 * m_pad * m_pad),
        transcendentals=0,
        bytes_accessed=int(m_pad * k_grid * stream_dtype.itemsize
                           + m_pad * m_pad * 4 + 4),
    )
    loss = pl.pallas_call(
        functools.partial(_style_loss_kernel,
                          inv_norm=inv_norm, inv_mse_denom=inv_mse_denom),
        out_shape=jax.ShapeDtypeStruct((1, 1), jnp.float32),
        grid=(k_grid // tk,),
        in_specs=[
            pl.BlockSpec((m_pad, tk), lambda kk: (0, kk)),  # streamed K tiles
            pl.BlockSpec(memory_space=pl.ANY),              # target: raw HBM ref
        ],
        # Scalar loss lives in SMEM; the gram is never written back to HBM.
        out_specs=pl.BlockSpec(memory_space=pltpu.MemorySpace.SMEM),
        scratch_shapes=[
            pltpu.VMEM((m_pad, m_pad), jnp.float32),   # gram accumulator
            pltpu.VMEM((m_pad, m_pad), jnp.float32),   # target (single buffer)
            pltpu.SemaphoreType.DMA((1,)),             # target DMA semaphore
        ],
        compiler_params=pltpu.CompilerParams(
            dimension_semantics=("arbitrary",),
            vmem_limit_bytes=vmem_limit),
        cost_estimate=cost,
    )(feats, tgt)
    return x, loss[0, 0]


def _f32_gram_ref(t):
    a, b, c, d = t.shape
    f = t.reshape(a * b, c * d).astype(jnp.float32)
    g = jnp.dot(f, f.T, precision=lax.Precision.HIGHEST)
    return g / float(a * b * c * d)


if __name__ == "__main__":
    # Small NCHW shapes: M = a*b = 8, K = c*d = 256.
    key = jax.random.PRNGKey(0)
    k_tgt, k_in = jax.random.split(key)
    target_feature = jax.random.normal(k_tgt, (2, 4, 16, 16), dtype=jnp.float32)
    x = jax.random.normal(k_in, (2, 4, 16, 16), dtype=jnp.float32)

    # __init__: target gram matrix (detached constant), bf16-streamed kernel.
    # tk=128 forces a 2-step K grid so the accumulate/init/finalize/DMA-overlap
    # path is exercised.
    target_gram = gram_matrix(target_feature, tk=128)

    # forward (default bf16 streaming, f32 accumulation)
    out, loss = style_loss_forward(x, target_gram, tk=128)
    out = jax.block_until_ready(out)
    loss = jax.block_until_ready(loss)

    # Pure-JAX f32 references.
    ref_tgt = _f32_gram_ref(target_feature)
    ref_loss = jnp.mean((_f32_gram_ref(x) - target_gram) ** 2)

    # Passthrough output.
    assert out.shape == x.shape and jnp.allclose(out, x)
    # bf16-streamed path: documented tolerance (inputs rounded to bf16, f32 acc).
    assert jnp.allclose(target_gram, ref_tgt, rtol=2e-2, atol=1e-3)
    assert jnp.allclose(loss, ref_loss, rtol=3e-2, atol=1e-5)

    # Optional f32-streaming path (exercises f32 tiling / m_pad=8); tolerance
    # covers the MXU's default multi-pass f32 handling.
    g32 = gram_matrix(target_feature, tk=128, stream_dtype=jnp.float32)
    _, loss32 = style_loss_forward(x, ref_tgt, tk=128, stream_dtype=jnp.float32)
    g32 = jax.block_until_ready(g32)
    loss32 = jax.block_until_ready(loss32)
    ref_loss32 = jnp.mean((_f32_gram_ref(x) - ref_tgt) ** 2)
    assert jnp.allclose(g32, ref_tgt, rtol=2e-2, atol=1e-3)
    assert jnp.allclose(loss32, ref_loss32, rtol=3e-2, atol=1e-5)

    print("KERNEL_OK")
</pallas_src>

<mosaic_0001>
module attributes {stable_mosaic.version = 11 : i64} {
  func.func @_gram_kernel(%arg0: i32, %arg1: memref<16x128xbf16, #tpu.memory_space<vmem>>, %arg2: memref<16x16xf32, #tpu.memory_space<vmem>>) attributes {dimension_semantics = [#tpu.dimension_semantics<arbitrary>], iteration_bounds = array<i64: 2>, scalar_prefetch = 0 : i64, scratch_operands = 0 : i64, tpu.core_type = #tpu.core_type<tc>, window_params = [{transform_indices = @transform_0, window_bounds = array<i64: 16, 128>}, {pipeline_mode = #tpu.pipeline_mode<synchronous>, transform_indices = @transform_1, window_bounds = array<i64: 16, 16>}]} {
    %c0_i32 = arith.constant 0 : i32
    %0 = arith.cmpi eq, %arg0, %c0_i32 : i32
    %1 = arith.extui %0 : i1 to i32
    %c0_i32_0 = arith.constant 0 : i32
    %2 = arith.cmpi ne, %1, %c0_i32_0 : i32
    scf.if %2 {
      %cst_7 = arith.constant 0.000000e+00 : f32
      %11 = vector.broadcast %cst_7 : f32 to vector<16x16xf32>
      %c0_8 = arith.constant 0 : index
      %c0_9 = arith.constant 0 : index
      %12 = vector.load %arg2[%c0_8, %c0_9] : memref<16x16xf32, #tpu.memory_space<vmem>>, vector<16x16xf32>
      tpu.vector_store %arg2[%c0_8, %c0_9], %11 {strides = array<i32>} : memref<16x16xf32, #tpu.memory_space<vmem>>, vector<16x16xf32>,
    } else {
    }
    %c0 = arith.constant 0 : index
    %c0_1 = arith.constant 0 : index
    %3 = vector.load %arg1[%c0, %c0_1] : memref<16x128xbf16, #tpu.memory_space<vmem>>, vector<16x128xbf16>
    %c0_2 = arith.constant 0 : index
    %c0_3 = arith.constant 0 : index
    %4 = vector.load %arg2[%c0_2, %c0_3] : memref<16x16xf32, #tpu.memory_space<vmem>>, vector<16x16xf32>
    %cst = arith.constant dense<0.000000e+00> : vector<16x16xf32>
    %5 = tpu.matmul %3, %3, %cst {dimension_numbers = #tpu.dot_dimension_numbers<[1], [1], [0], [0], [0, 0, 1, 0], [], []>} : vector<16x128xbf16>, vector<16x128xbf16>, vector<16x16xf32> -> vector<16x16xf32>
    %6 = arith.addf %4, %5 : vector<16x16xf32>
    %c0_4 = arith.constant 0 : index
    %c0_5 = arith.constant 0 : index
    %7 = vector.load %arg2[%c0_4, %c0_5] : memref<16x16xf32, #tpu.memory_space<vmem>>, vector<16x16xf32>
    tpu.vector_store %arg2[%c0_4, %c0_5], %6 {strides = array<i32>} : memref<16x16xf32, #tpu.memory_space<vmem>>, vector<16x16xf32>,
    %c1_i32 = arith.constant 1 : i32
    %8 = arith.cmpi eq, %arg0, %c1_i32 : i32
    %9 = arith.extui %8 : i1 to i32
    %c0_i32_6 = arith.constant 0 : i32
    %10 = arith.cmpi ne, %9, %c0_i32_6 : i32
    scf.if %10 {
      %c0_7 = arith.constant 0 : index
      %c0_8 = arith.constant 0 : index
      %11 = vector.load %arg2[%c0_7, %c0_8] : memref<16x16xf32, #tpu.memory_space<vmem>>, vector<16x16xf32>
      %cst_9 = arith.constant 4.8828125E-4 : f32
      %12 = vector.broadcast %cst_9 : f32 to vector<16x16xf32>
      %13 = arith.mulf %11, %12 : vector<16x16xf32>
      %c0_10 = arith.constant 0 : index
      %c0_11 = arith.constant 0 : index
      %14 = vector.load %arg2[%c0_10, %c0_11] : memref<16x16xf32, #tpu.memory_space<vmem>>, vector<16x16xf32>
      tpu.vector_store %arg2[%c0_10, %c0_11], %13 {strides = array<i32>} : memref<16x16xf32, #tpu.memory_space<vmem>>, vector<16x16xf32>,
    } else {
    }
    return
  }
  func.func @transform_0(%arg0: i32) -> (i32, i32) {
    %c0_i32 = arith.constant 0 : i32
    %c0_i32_0 = arith.constant 0 : i32
    return %c0_i32, %arg0 : i32, i32
  }
  func.func @transform_1(%arg0: i32) -> (i32, i32) {
    %c0_i32 = arith.constant 0 : i32
    %c0_i32_0 = arith.constant 0 : i32
    %c0_i32_1 = arith.constant 0 : i32
    return %c0_i32, %c0_i32_0 : i32, i32
  }
}

</mosaic_0001>

<bundles_post_ra>
// kernel: tpu_custom_call.1
= control target key start
LH: loop header
LB: loop body
LE: loop exit
PB: predicated region body
PF: predicated region fallthrough
CT: control target
= control target key end

     0   :  { %6 = vsyncpa [#allocation3], 0  ;;  %s578_s0 = inlined_call_operand.hbm [shape: bf16[16,256], index: 0, kind: input, shape index: {}]   ;;  %s579_s1 = inlined_call_operand.hbm [shape: f32[16,16], index: 1, kind: output, shape index: {}]  }
   0x1   :  { %8 = vsyncpa [#allocation3 + $0x1], 0 }
   0x2   :  { %9 = vsyncpa [#allocation4], 0  ;;  %s448_s6 = smov 0   ;;  %s450_s7 = smov 0  }
   0x3   :  { %s452_s8 = smov 0   ;;  %s454_s9 = smov 0  }
   0x4 LB: > { %s467_s10 = sadd.s32 4294967295, %s426_s9   ;;  %s470_s11 = sadd.s32 1, %s426_s9   ;;  %s426_s9 = sphi %s454_s9, %s585_s9   ;;  %s422_s8 = sphi %s452_s8, %s584_s8   ;;  %s418_s7 = sphi %s450_s7, %s583_s7   ;;  %s414_s6 = sphi %s448_s6, %s582_s6  }
   0x5   : > { %s19_s12 = ssub.s32 %s426_s9, %s470_s11  ;;  %s22_s13 = sadd.s32 1, %s422_s8 }
   0x6   : > { %p20_p0 = scmp.eq.s32.totalorder %s19_s12, 0  ;;  %p29_p1 = scmp.ne.s32.totalorder %s422_s8, %s418_s7 }
   0x7   : > { %p30_p2 = scmp.eq.s32.totalorder %s426_s9, 0  ;;  %p35_p3 = scmp.ne.s32.totalorder %s418_s7, %s414_s6 }
   0x8   : > { %s480_s14 = scalar_select %p20_p0, %s422_s8, %s22_s13  }
   0x9   : > { %p31_p4 = por %p30_p2, %p29_p1  ;;  %p36_p5 = scmp.eq.s32.totalorder %s467_s10, 0 }
   0xa   : > { %p287_p6 = scmp.lt.s32.totalorder %s426_s9, 2  ;;  %s80_s16 = sand.u32 1, %s422_s8  }
   0xb   : > { %p484_p7 = por %p36_p5, %p35_p3  ;;  %s258_s17 = sshll.u32 %s80_s16, 3 }
   0xc   : > { %s259_s18 = sshll.u32 %s426_s9, 6  ;;  %s84_s22 = scalar_lea.vmem [#allocation2], %s258_s17 }
   0xd   : > { %s493_s21 = scalar_lea.hbm %s578_s0, %s259_s18  ;;  %s90_s23 = sshll.u32 %s84_s22, 4  ;;  %s495_s23 = int_to_ptr.vmem [resolvable:$true] %s90_s23 }
   0xe   : > { %p497_p8 = pnand %p287_p6, %p31_p4  ;;  %s501_s25 = scalar_lea.sflag [#allocation3], %s80_s16 }
   0xf   : > { %s332_s26 = scalar_lea.hbm %s493_s21, 128  ;;  %s337_s29 = scalar_lea.hbm %s578_s0, 256 }
  0x10   : > { %p333_p9 = scmp.ne.s32.totalorder %s493_s21, %s332_s26  ;;  %p334_p10 = pneg %p497_p8 }
  0x11   : > { %p338_p13 = scmp.lt.u32.totalorder %s493_s21, %s578_s0  ;;  %p339_p0 = scmp.lt.u32.totalorder %s337_s29, %s332_s26 }
  0x12   : > { %p335_p11 = pnand %p334_p10, %p333_p9  ;;  %p341_p2 = scmp.lt.u32.totalorder %s332_s26, %s493_s21 }
  0x13   : > { %p340_p1 = por %p339_p0, %p338_p13 }
  0x14   : > { %p336_p12 = pneg %p335_p11 }
  0x15   : > { %p342_p3 = por %p341_p2, %p340_p1 }
  0x17   : > { %p343_p4 = pnand %p342_p3, %p336_p12 }
  0x19   : > { %346 = shalt.err (!%p343_p4)
}
  0x1a   : > { %s347_s3 = scalar_lea.vmem %s495_s23, 128  ;;  %s428_s4 = smov [#allocation2]  }
  0x1b   : > { %p348_p5 = scmp.ne.s32.totalorder %s495_s23, %s347_s3  ;;  %s352_s5 = sshll.u32 %s428_s4, 4  ;;  %s353_s5 = int_to_ptr.vmem [resolvable:$false] %s352_s5 }
  0x1c   : > { %s354_s6 = scalar_lea.vmem %s353_s5, 256  ;;  %p355_p11 = scmp.lt.s32.totalorder %s495_s23, %s353_s5 }
  0x1d   : > { %p350_p6 = pnand %p348_p5, %p334_p10  ;;  %p356_p13 = scmp.lt.s32.totalorder %s354_s6, %s347_s3 }
  0x1f   : > { %p351_p9 = pneg %p350_p6  ;;  %p357_p0 = por %p356_p13, %p355_p11 }
  0x21   : > { %p358_p1 = pnand %p357_p0, %p351_p9 }
  0x23   : > { %361 = shalt.err (!%p358_p1)
}
  0x24   : > { %s429_s12 = smov 128   ;;  %s430_s13 = smov 64  }
  0x25   : > { %s431_s16 = smov 4   ;;  %p260_p10 = scmp.ge.s32.totalorder %s426_s9, 1 }
  0x26   : > { %286 = dma.hbm_to_vmem [thread:$0]  (!%p497_p8), %s493_s21, 128, %s495_s23, %s501_s25, %s429_s12, %s430_s13, %s431_s16  }
  0x27   : > { %p98_p12 = scmp.lt.s32.totalorder %s426_s9, 3 }
  0x29   : > { %p99_p2 = pnand %p260_p10, %p98_p12 }
  0x2a   : > { %s104_s17 = sand.u32 (!%p99_p2), 1, %s418_s7  }
  0x2b   : > { %102 = sbr.rel (%p99_p2) target bundleno = 322 (0x142), region = 24  ;;  %s261_s18 = sshll.u32 (!%p99_p2), %s104_s17, 3 }
  0x2c   : > { %s105_s19 = scalar_lea.sflag (!%p99_p2), [#allocation3], %s104_s17  ;;  %s108_s20 = scalar_lea.vmem (!%p99_p2), [#allocation2], %s261_s18 }
  0x32   : > { %405 = dma.done.wait (%p484_p7), %s105_s19, 128  }
  0x33   : > { %407 = vsyncadd (%p484_p7), %s105_s19, 4294967168  ;;  %p262_p3 = scmp.ne.s32.totalorder %s467_s10, 0 }
  0x34   : > { %vm127_vm0 = vcmask (!%p262_p3), 130048   ;;  %v432_v0 = vmov (!%p262_p3), 0.0  }
  0x35   : > { %126 = sbr.rel (%p262_p3) target bundleno = 60 (0x3c), region = 32  ;;  %128 = vst.msk [vmem:[#allocation5] sm:$0xff] (!%p262_p3), %vm127_vm0, %v432_v0  ;;  %129 = vst.msk [vmem:[#allocation5 + $0x8] sm:$0xff] (!%p262_p3), %vm127_vm0, %v432_v0 }
  0x3c PF: > { %v331_v1 = vld [vmem:[%s108_s20] sm:$0xff]   ;;  %v433_v2 = vmov 0.0   ;;  %vm434_vm1 = vmmov 0   ;;  %v132_v3 = vld [vmem:[#allocation5] sm:$0xff]  ;;  %vm183_vm2 = vcmask 130048   ;;  %v133_v5 = vld [vmem:[#allocation5 + $0x8] sm:$0xff] }
  0x3d   : > { %271 = vmatprep.subr.bf16.mxu0 %v433_v2  ;;  %273 = vmatprep.mubr.msk.bf16.mxu0 %vm434_vm1, %v433_v2  ;;  %p264_p7 = scmp.ne.s32.totalorder %s467_s10, 1 }
  0x3e   : > { %272 = vmatpush3.bf16.xpose.msra.mxu0 %v331_v1 }
  0x45   : > { %274 = vmatmul.mubr.bf16.vlgmr.msra.gmra.mrb[0].mxu0 %v331_v1 }
 0x117   : > { %189 = sbr.rel (%p264_p7) target bundleno = 296 (0x128), region = 36 }
 0x118   : > { %v174_v4 = vpop.f32.mrb[0].mxu0 }
 0x119   : > { %v181_v6 = vadd.f32 %v174_v4, %v132_v3  ;;  %v275_v7 = vpop.f32.mrb[1].mxu0 }
 0x11a   : > { %v177_v8 = vpop.f32.mrb[2].mxu0 }
 0x11b   : > { %184 = vst.msk [vmem:[#allocation5] sm:$0xff] %vm183_vm2, %v181_v6  ;;  %v182_v9 = vadd.f32 %v177_v8, %v133_v5  ;;  %v276_v10 = vpop.f32.mrb[3].mxu0 }
 0x11d   : > { %185 = vst.msk [vmem:[#allocation5 + $0x8] sm:$0xff] %vm183_vm2, %v182_v9 }
 0x122   : > { %v190_v11 = vld [vmem:[#allocation5] sm:$0xff] }
 0x123   : > { %v192_v13 = vmul.f32 0.00048828125, %v190_v11 }
 0x124   : > { %v191_v12 = vld [vmem:[#allocation5 + $0x8] sm:$0xff] }
 0x125   : > { %v193_v14 = vmul.f32 0.00048828125, %v191_v12  ;;  %194 = vst.msk [vmem:[#allocation5] sm:$0xff] %vm183_vm2, %v192_v13 }
 0x127   : > { %195 = vst.msk [vmem:[#allocation5 + $0x8] sm:$0xff] %vm183_vm2, %v193_v14 }
 0x128 PF: > { %p288_p8 = scmp.eq.s32.totalorder %s467_s10, 1  ;;  %s435_s9 = smov [#allocation5]  }
 0x129   : > { %s202_s15 = sshll.u32 %s435_s9, 4  ;;  %s203_s15 = int_to_ptr.vmem [resolvable:$true] %s202_s15 }
 0x12a   : > { %s362_s21 = scalar_lea.vmem %s203_s15, 256  ;;  %p369_p9 = scmp.lt.s32.totalorder %s203_s15, %s203_s15 }
 0x12b   : > { %p363_p4 = scmp.ne.s32.totalorder %s203_s15, %s362_s21  ;;  %p370_p11 = scmp.lt.s32.totalorder %s362_s21, %s362_s21 }
 0x12d   : > { %p364_p5 = pnand %p363_p4, %p288_p8  ;;  %p371_p13 = por %p370_p11, %p369_p9 }
 0x12f   : > { %p365_p6 = pneg %p364_p5 }
 0x131   : > { %p372_p0 = pnand %p371_p13, %p365_p6 }
 0x133   : > { %375 = shalt.err (!%p372_p0)
}
 0x134   : > { %s376_s24 = scalar_lea.hbm %s579_s1, 256 }
 0x135   : > { %p377_p1 = scmp.ne.s32.totalorder %s579_s1, %s376_s24  ;;  %p382_p2 = scmp.lt.u32.totalorder %s376_s24, %s579_s1 }
 0x137   : > { %p378_p10 = pnand %p377_p1, %p288_p8 }
 0x139   : > { %p379_p12 = pneg %p378_p10 }
 0x13b   : > { %p384_p3 = pnand %p382_p2, %p379_p12 }
 0x13d   : > { %387 = shalt.err (!%p384_p3)
}
 0x13e   : > { %s436_s29 = smov 128   ;;  %s437_s30 = smov 8  }
 0x13f   : > { %280 = dma.vmem_to_hbm [thread:$0]  (%p288_p8), %s203_s15, 256, %s579_s1, [#allocation4], %s436_s29, %s436_s29, %s437_s30  }
 0x140   : > { %409 = dma.done.wait (%p288_p8), [#allocation4], 256  }
 0x141   : > { %411 = vsyncadd (%p288_p8), [#allocation4], 4294967040 }
 0x142 PF: > { %p12_p7 = scmp.ge.s32.totalorder %s470_s11, 4   ;;  %s582_s6 = smov %s418_s7 }
 0x143   : > { %s583_s7 = smov %s422_s8  ;;  %s584_s8 = smov %s480_s14 }
 0x144   : > { %s585_s9 = smov %s470_s11  ;;  %14 = sbr.rel (!%p12_p7) target bundleno = 4 (0x4), region = 69 }
 0x14b   :  { %218 = vsyncpa [#allocation3], 1 }
 0x14c   :  { %220 = vsyncpa [#allocation3 + $0x1], 1 }
 0x14d   :  { %221 = vsyncpa [#allocation4], 1 }
 0x14e   :  { %223 = vsyncpa [#allocation4 + $0x1], 1 }

</bundles_post_ra>
